<compile_context>
chip_gen: v7x
topology: tpu7x:2x2x1
jax: 0.10.0
libtpu: 0.0.40
codegen_flags: <defaults>
</compile_context>

<pallas_src>
import jax
import jax.numpy as jnp
from jax import lax
from jax.experimental import pallas as pl
from jax.experimental.pallas import tpu as pltpu


def _round_up(a, b):
    return ((a + b - 1) // b) * b


def _divisor_tile(hp, target):
    """Largest multiple of 128 that divides hp and is <= target."""
    t = min(target, hp)
    t = (t // 128) * 128
    while t > 128 and hp % t != 0:
        t -= 128
    return max(t, 128)


def gate_kernel(x_ref, w_ref, b_ref, o_ref):
    # x_ref : (tm, Hp)  activation tile (original dtype)
    # w_ref : (Hp, tn)  weight in (in, out) layout (bf16 or f32)
    # b_ref : (1, tn)   bias (f32)
    # o_ref : (tm, tn)  output tile
    x = x_ref[...]
    xm = x.astype(w_ref.dtype)                       # bf16 cast for the MXU (no-op in f32 mode)
    proj = lax.dot_general(                          # canonical (M,K)x(K,N) on the MXU
        xm, w_ref[...],
        dimension_numbers=(((1,), (0,)), ((), ())),
        preferred_element_type=jnp.float32,
    )
    proj = proj + b_ref[...].astype(jnp.float32)
    gate = jax.nn.sigmoid(proj)                      # EUP, f32

    tn = o_ref.shape[-1]
    if tn == x.shape[-1]:
        # Resident-weight path: gate the whole tile.
        x_g = x
    else:
        # N-tiled path: gate only this output-column slab of x.
        col = pl.multiple_of(pl.program_id(1) * tn, 128)
        x_g = x_ref[:, pl.ds(col, tn)]
    o_ref[...] = (x_g.astype(jnp.float32) * gate).astype(o_ref.dtype)


def prepare_gate_params(weight, bias, *, matmul_dtype=jnp.bfloat16):
    """One-off parameter prep (do this at load time, NOT per forward call).

    weight: (H, H) PyTorch (out, in) layout; bias: (H,).
    Returns (w_t, b2d): (Hp, Hp) weight in (in, out) layout cast to
    matmul_dtype, and (1, Hp) f32 bias, both zero-padded to Hp = ceil128(H).
    """
    H = weight.shape[0]
    Hp = _round_up(H, 128)
    w_t = weight.T                                   # (in, out) = (K, N)
    b = bias
    if Hp != H:
        w_t = jnp.pad(w_t, ((0, Hp - H), (0, Hp - H)))
        b = jnp.pad(b, (0, Hp - H))
    w_t = w_t.astype(matmul_dtype)
    b2d = b.reshape(1, Hp).astype(jnp.float32)
    return w_t, b2d


def gate_forward(x, w_t, b2d):
    """x: (..., H); w_t/b2d from prepare_gate_params. Returns x * sigmoid(x @ W.T + b)."""
    orig_shape = x.shape
    H = orig_shape[-1]
    Hp = w_t.shape[0]

    M = 1
    for d in orig_shape[:-1]:
        M *= d
    x2d = x.reshape(M, H)
    if Hp != H:
        # Per-call lane padding of x only (params are pre-padded).
        x2d = jnp.pad(x2d, ((0, 0), (0, Hp - H)))

    x_it = x2d.dtype.itemsize
    w_it = w_t.dtype.itemsize
    o_it = x.dtype.itemsize

    # --- per-chip VMEM budget with headroom ---------------------------------
    try:
        info = pltpu.get_tpu_info()
        vmem_cap = int(getattr(info, "vmem_capacity_bytes", 64 << 20))
    except Exception:
        vmem_cap = 64 << 20                          # conservative (v7x-sized) fallback
    budget = max(vmem_cap - (16 << 20), 32 << 20)    # ~48 MiB v7x, ~112 MiB v5e/v6e

    bias_bytes = Hp * 4
    sub = 8 if x_it >= 4 else 16

    # --- resident weight vs streamed (N-tiled) weight -----------------------
    resident = (Hp * Hp * w_it + bias_bytes + 2 * 256 * Hp * (x_it + o_it)) <= budget
    if resident:
        tn = Hp
        fixed = Hp * Hp * w_it + bias_bytes                  # single-buffered weight + bias
        per_tm = 2 * Hp * (x_it + o_it)                      # double-buffered x/out tiles
    else:
        tn = _divisor_tile(Hp, 512)
        fixed = 2 * Hp * tn * w_it + 2 * bias_bytes          # double-buffered weight slab
        per_tm = 2 * Hp * x_it + 2 * tn * o_it

    # --- budget-driven tm (multiple of 256, capped, shrunk for small M) -----
    tm = 256
    while tm + 256 <= 2048 and fixed + (tm + 256) * per_tm <= budget:
        tm += 256
    tm = min(tm, _round_up(M, sub))
    grid_m = pl.cdiv(M, tm)
    grid_n = Hp // tn

    needed = fixed + tm * per_tm
    vmem_limit = int(min(max(needed + (8 << 20), 32 << 20), budget))
    if vmem_limit < needed + (2 << 20):
        vmem_limit = int(needed + (2 << 20))

    cost = pl.CostEstimate(
        flops=2 * M * Hp * Hp,
        transcendentals=M * Hp,
        bytes_accessed=int(M * Hp * (x_it + o_it) + Hp * Hp * w_it + Hp * 4),
    )

    def run(single_buffer_resident):
        def resident_spec(shape, imap):
            if single_buffer_resident:
                return pl.BlockSpec(shape, imap, pipeline_mode=pl.Buffered(1))
            return pl.BlockSpec(shape, imap)

        in_specs = [pl.BlockSpec((tm, Hp), lambda i, j: (i, 0))]      # x tile (pipelined)
        if resident:
            in_specs.append(resident_spec((Hp, tn), lambda i, j: (0, 0)))   # weight (resident)
            in_specs.append(resident_spec((1, tn), lambda i, j: (0, 0)))    # bias (resident)
        else:
            in_specs.append(pl.BlockSpec((Hp, tn), lambda i, j: (0, j)))    # weight slab (streamed)
            in_specs.append(pl.BlockSpec((1, tn), lambda i, j: (0, j)))     # bias slab

        out = pl.pallas_call(
            gate_kernel,
            out_shape=jax.ShapeDtypeStruct((M, Hp), x.dtype),
            grid_spec=pltpu.PrefetchScalarGridSpec(
                num_scalar_prefetch=0,
                grid=(grid_m, grid_n),
                in_specs=in_specs,
                out_specs=pl.BlockSpec((tm, tn), lambda i, j: (i, j)),
            ),
            compiler_params=pltpu.CompilerParams(
                dimension_semantics=("parallel", "arbitrary"),
                vmem_limit_bytes=vmem_limit,
            ),
            cost_estimate=cost,
        )(x2d, w_t, b2d)
        return jax.block_until_ready(out)

    try:
        out = run(True)
    except Exception:
        # Fallback for jax versions without BlockSpec(pipeline_mode=...):
        # default double-buffering for the resident weight/bias.
        out = run(False)

    if Hp != H:
        out = out[:, :H]
    return out.reshape(orig_shape)


if __name__ == "__main__":
    # Small shapes consistent with the module: batch=2, seq=8, hidden=32.
    B, S, H = 2, 8, 32
    key = jax.random.PRNGKey(0)
    kx, kw, kb = jax.random.split(key, 3)

    x = jax.random.normal(kx, (B, S, H), dtype=jnp.float32)
    # Mimic nn.Linear's uniform(-1/sqrt(H), 1/sqrt(H)) init, PyTorch (out, in) layout.
    bound = 1.0 / (H ** 0.5)
    weight = jax.random.uniform(kw, (H, H), minval=-bound, maxval=bound,
                                dtype=jnp.float32)
    bias = jax.random.uniform(kb, (H,), minval=-bound, maxval=bound,
                              dtype=jnp.float32)

    ref = x * jax.nn.sigmoid(x @ weight.T + bias)

    # Default path: bf16 matmul operands, f32 accumulation / bias / gating.
    w_bf16, b_p = prepare_gate_params(weight, bias, matmul_dtype=jnp.bfloat16)
    out_bf16 = jax.block_until_ready(gate_forward(x, w_bf16, b_p))
    assert out_bf16.shape == ref.shape, "shape mismatch vs reference (bf16 path)"
    assert jnp.allclose(out_bf16, ref, atol=2e-2, rtol=2e-2), "mismatch vs reference (bf16 path)"

    # Opt-in exact-f32 path.
    w_f32, b_p32 = prepare_gate_params(weight, bias, matmul_dtype=jnp.float32)
    out_f32 = jax.block_until_ready(gate_forward(x, w_f32, b_p32))
    assert out_f32.shape == ref.shape, "shape mismatch vs reference (f32 path)"
    assert jnp.allclose(out_f32, ref, atol=1e-5, rtol=1e-5), "mismatch vs reference (f32 path)"

    print("KERNEL_OK")
</pallas_src>

<mosaic_0001>
module attributes {stable_mosaic.version = 11 : i64} {
  func.func @gate_kernel(%arg0: i32, %arg1: i32, %arg2: memref<16x128xf32, #tpu.memory_space<vmem>>, %arg3: memref<128x128xbf16, #tpu.memory_space<vmem>>, %arg4: memref<1x128xf32, #tpu.memory_space<vmem>>, %arg5: memref<16x128xf32, #tpu.memory_space<vmem>>) attributes {dimension_semantics = [#tpu.dimension_semantics<parallel>, #tpu.dimension_semantics<arbitrary>], iteration_bounds = array<i64: 1, 1>, scalar_prefetch = 0 : i64, scratch_operands = 0 : i64, tpu.core_type = #tpu.core_type<tc>, window_params = [{transform_indices = @transform_0, window_bounds = array<i64: 16, 128>}, {pipeline_mode = #tpu.pipeline_mode<synchronous>, transform_indices = @transform_1, window_bounds = array<i64: 128, 128>}, {pipeline_mode = #tpu.pipeline_mode<synchronous>, transform_indices = @transform_2, window_bounds = array<i64: 1, 128>}, {transform_indices = @transform_3, window_bounds = array<i64: 16, 128>}]} {
    %c0 = arith.constant 0 : index
    %c0_0 = arith.constant 0 : index
    %0 = vector.load %arg2[%c0, %c0_0] : memref<16x128xf32, #tpu.memory_space<vmem>>, vector<16x128xf32>
    %1 = arith.truncf %0 : vector<16x128xf32> to vector<16x128xbf16>
    %c0_1 = arith.constant 0 : index
    %c0_2 = arith.constant 0 : index
    %2 = vector.load %arg3[%c0_1, %c0_2] : memref<128x128xbf16, #tpu.memory_space<vmem>>, vector<128x128xbf16>
    %cst = arith.constant dense<0.000000e+00> : vector<16x128xf32>
    %3 = tpu.matmul %1, %2, %cst {dimension_numbers = #tpu.dot_dimension_numbers<[1], [0], [0], [1], [0, 0, 1, 1], [], []>} : vector<16x128xbf16>, vector<128x128xbf16>, vector<16x128xf32> -> vector<16x128xf32>
    %c0_3 = arith.constant 0 : index
    %c0_4 = arith.constant 0 : index
    %4 = vector.load %arg4[%c0_3, %c0_4] : memref<1x128xf32, #tpu.memory_space<vmem>>, vector<1x128xf32>
    %5 = vector.broadcast %4 : vector<1x128xf32> to vector<16x128xf32>
    %6 = arith.addf %3, %5 : vector<16x128xf32>
    %7 = arith.negf %6 : vector<16x128xf32>
    %8 = math.exp %7 : vector<16x128xf32>
    %cst_5 = arith.constant 1.000000e+00 : f32
    %9 = vector.broadcast %cst_5 : f32 to vector<16x128xf32>
    %10 = arith.addf %9, %8 : vector<16x128xf32>
    %11 = arith.divf %9, %10 : vector<16x128xf32>
    %12 = arith.mulf %0, %11 : vector<16x128xf32>
    %c0_6 = arith.constant 0 : index
    %c0_7 = arith.constant 0 : index
    %13 = vector.load %arg5[%c0_6, %c0_7] : memref<16x128xf32, #tpu.memory_space<vmem>>, vector<16x128xf32>
    tpu.vector_store %arg5[%c0_6, %c0_7], %12 {strides = array<i32>} : memref<16x128xf32, #tpu.memory_space<vmem>>, vector<16x128xf32>,
    return
  }
  func.func @transform_0(%arg0: i32, %arg1: i32) -> (i32, i32) {
    %c0_i32 = arith.constant 0 : i32
    %c0_i32_0 = arith.constant 0 : i32
    return %arg0, %c0_i32 : i32, i32
  }
  func.func @transform_1(%arg0: i32, %arg1: i32) -> (i32, i32) {
    %c0_i32 = arith.constant 0 : i32
    %c0_i32_0 = arith.constant 0 : i32
    %c0_i32_1 = arith.constant 0 : i32
    return %c0_i32, %c0_i32_0 : i32, i32
  }
  func.func @transform_2(%arg0: i32, %arg1: i32) -> (i32, i32) {
    %c0_i32 = arith.constant 0 : i32
    %c0_i32_0 = arith.constant 0 : i32
    %c0_i32_1 = arith.constant 0 : i32
    return %c0_i32, %c0_i32_0 : i32, i32
  }
  func.func @transform_3(%arg0: i32, %arg1: i32) -> (i32, i32) {
    %c0_i32 = arith.constant 0 : i32
    return %arg0, %arg1 : i32, i32
  }
}

module attributes {stable_mosaic.version = 11 : i64} {
  func.func @gate_kernel(%arg0: i32, %arg1: i32, %arg2: memref<16x128xf32, #tpu.memory_space<vmem>>, %arg3: memref<128x128xbf16, #tpu.memory_space<vmem>>, %arg4: memref<1x128xf32, #tpu.memory_space<vmem>>, %arg5: memref<16x128xf32, #tpu.memory_space<vmem>>) attributes {dimension_semantics = [#tpu.dimension_semantics<parallel>, #tpu.dimension_semantics<arbitrary>], iteration_bounds = array<i64: 1, 1>, scalar_prefetch = 0 : i64, scratch_operands = 0 : i64, tpu.core_type = #tpu.core_type<tc>, window_params = [{transform_indices = @transform_0, window_bounds = array<i64: 16, 128>}, {pipeline_mode = #tpu.pipeline_mode<synchronous>, transform_indices = @transform_1, window_bounds = array<i64: 128, 128>}, {pipeline_mode = #tpu.pipeline_mode<synchronous>, transform_indices = @transform_2, window_bounds = array<i64: 1, 128>}, {transform_indices = @transform_3, window_bounds = array<i64: 16, 128>}]} {
    %c0 = arith.constant 0 : index
    %c0_0 = arith.constant 0 : index
    %0 = vector.load %arg2[%c0, %c0_0] : memref<16x128xf32, #tpu.memory_space<vmem>>, vector<16x128xf32>
    %1 = arith.truncf %0 : vector<16x128xf32> to vector<16x128xbf16>
    %c0_1 = arith.constant 0 : index
    %c0_2 = arith.constant 0 : index
    %2 = vector.load %arg3[%c0_1, %c0_2] : memref<128x128xbf16, #tpu.memory_space<vmem>>, vector<128x128xbf16>
    %cst = arith.constant dense<0.000000e+00> : vector<16x128xf32>
    %3 = tpu.matmul %1, %2, %cst {dimension_numbers = #tpu.dot_dimension_numbers<[1], [0], [0], [1], [0, 0, 1, 1], [], []>} : vector<16x128xbf16>, vector<128x128xbf16>, vector<16x128xf32> -> vector<16x128xf32>
    %c0_3 = arith.constant 0 : index
    %c0_4 = arith.constant 0 : index
    %4 = vector.load %arg4[%c0_3, %c0_4] : memref<1x128xf32, #tpu.memory_space<vmem>>, vector<1x128xf32>
    %5 = vector.broadcast %4 : vector<1x128xf32> to vector<16x128xf32>
    %6 = arith.addf %3, %5 : vector<16x128xf32>
    %7 = arith.negf %6 : vector<16x128xf32>
    %8 = math.exp %7 : vector<16x128xf32>
    %cst_5 = arith.constant 1.000000e+00 : f32
    %9 = vector.broadcast %cst_5 : f32 to vector<16x128xf32>
    %10 = arith.addf %9, %8 : vector<16x128xf32>
    %11 = arith.divf %9, %10 : vector<16x128xf32>
    %12 = arith.mulf %0, %11 : vector<16x128xf32>
    %c0_6 = arith.constant 0 : index
    %c0_7 = arith.constant 0 : index
    %13 = vector.load %arg5[%c0_6, %c0_7] : memref<16x128xf32, #tpu.memory_space<vmem>>, vector<16x128xf32>
    tpu.vector_store %arg5[%c0_6, %c0_7], %12 {strides = array<i32>} : memref<16x128xf32, #tpu.memory_space<vmem>>, vector<16x128xf32>,
    return
  }
  func.func @transform_0(%arg0: i32, %arg1: i32) -> (i32, i32) {
    %c0_i32 = arith.constant 0 : i32
    %c0_i32_0 = arith.constant 0 : i32
    return %arg0, %c0_i32 : i32, i32
  }
  func.func @transform_1(%arg0: i32, %arg1: i32) -> (i32, i32) {
    %c0_i32 = arith.constant 0 : i32
    %c0_i32_0 = arith.constant 0 : i32
    %c0_i32_1 = arith.constant 0 : i32
    return %c0_i32, %c0_i32_0 : i32, i32
  }
  func.func @transform_2(%arg0: i32, %arg1: i32) -> (i32, i32) {
    %c0_i32 = arith.constant 0 : i32
    %c0_i32_0 = arith.constant 0 : i32
    %c0_i32_1 = arith.constant 0 : i32
    return %c0_i32, %c0_i32_0 : i32, i32
  }
  func.func @transform_3(%arg0: i32, %arg1: i32) -> (i32, i32) {
    %c0_i32 = arith.constant 0 : i32
    return %arg0, %arg1 : i32, i32
  }
}

</mosaic_0001>

<bundles_post_ra>
// kernel: tpu_custom_call.1
= control target key start
LH: loop header
LB: loop body
LE: loop exit
PB: predicated region body
PF: predicated region fallthrough
CT: control target
= control target key end

     0   :  { %8 = vsyncpa [#allocation3], 0  ;;  %s404_s0 = inlined_call_operand.hbm [shape: f32[16,128], index: 0, kind: input, shape index: {}]   ;;  %s405_s1 = inlined_call_operand.hbm [shape: bf16[128,128], index: 1, kind: input, shape index: {}]   ;;  %s406_s2 = inlined_call_operand.vmem [shape: f32[1,128], index: 2, kind: input, shape index: {}]   ;;  %s407_s3 = inlined_call_operand.hbm [shape: f32[16,128], index: 3, kind: output, shape index: {}]  }
   0x1   :  { %9 = vsyncpa [#allocation6], 0 }
   0x2   :  { %10 = vsyncpa [#allocation4], 0  ;;  %s330_s12 = smov [#allocation2]   ;;  %s258_s16 = scalar_lea.hbm %s404_s0, 256 }
   0x3   :  { %s16_s13 = sshll.u32 %s330_s12, 4  ;;  %p259_p0 = scmp.ne.s32.totalorder %s404_s0, %s258_s16  ;;  %s17_s13 = int_to_ptr.vmem [resolvable:$true] %s16_s13 }
   0x4   :  { %p262_p1 = scmp.lt.u32.totalorder %s258_s16, %s404_s0 }
   0x6   :  { %p264_p2 = pnand %p262_p1, %p259_p0 }
   0x8   :  { %267 = shalt.err (!%p264_p2)
}
   0x9   :  { %s268_s21 = scalar_lea.vmem %s17_s13, 256  ;;  %p273_p4 = scmp.lt.s32.totalorder %s17_s13, %s17_s13 }
   0xa   :  { %p269_p3 = scmp.ne.s32.totalorder %s17_s13, %s268_s21  ;;  %p274_p5 = scmp.lt.s32.totalorder %s268_s21, %s268_s21 }
   0xc   :  { %p275_p6 = por %p274_p5, %p273_p4 }
   0xe   :  { %p276_p7 = pnand %p275_p6, %p269_p3 }
  0x10   :  { %279 = shalt.err (!%p276_p7)
}
  0x11   :  { %s331_s22 = smov 128   ;;  %s332_s23 = smov 8  }
  0x12   :  { %22 = dma.hbm_to_vmem [thread:$0]  %s404_s0, 256, %s17_s13, [#allocation3], %s331_s22, %s331_s22, %s332_s23  }
  0x13   :  { %s333_s26 = smov [#allocation5]   ;;  %s280_s30 = scalar_lea.hbm %s405_s1, 1024 }
  0x14   :  { %s28_s27 = sshll.u32 %s333_s26, 4  ;;  %p281_p8 = scmp.ne.s32.totalorder %s405_s1, %s280_s30  ;;  %s29_s27 = int_to_ptr.vmem [resolvable:$true] %s28_s27 }
  0x15   :  { %p284_p9 = scmp.lt.u32.totalorder %s280_s30, %s405_s1 }
  0x17   :  { %p286_p10 = pnand %p284_p9, %p281_p8 }
  0x19   :  { %289 = shalt.err (!%p286_p10)
}
  0x1a   :  { %s290_s8 = scalar_lea.vmem %s29_s27, 1024  ;;  %p295_p12 = scmp.lt.s32.totalorder %s29_s27, %s29_s27 }
  0x1b   :  { %p291_p11 = scmp.ne.s32.totalorder %s29_s27, %s290_s8  ;;  %p296_p13 = scmp.lt.s32.totalorder %s290_s8, %s290_s8 }
  0x1d   :  { %p297_p0 = por %p296_p13, %p295_p12 }
  0x1f   :  { %p298_p1 = pnand %p297_p0, %p291_p11 }
  0x21   :  { %301 = shalt.err (!%p298_p1)
}
  0x22   :  { %s334_s0 = smov 64   ;;  %s335_s9 = smov 4  }
  0x23   :  { %34 = dma.hbm_to_vmem [thread:$0]  %s405_s1, 1024, %s29_s27, [#allocation6], %s334_s0, %s334_s0, %s335_s9  }
  0x24   :  { %324 = dma.done.wait [#allocation3], 256  }
  0x25   :  { %325 = vsyncadd [#allocation3], 4294967040 }
  0x26   :  { %326 = dma.done.wait [#allocation6], 1024  }
  0x27   :  { %327 = vsyncadd [#allocation6], 4294966272  ;;  %v336_v0 = vmov 0.0   ;;  %vm337_vm0 = vmmov 0   ;;  %v242_v1 = vld [vmem:[#allocation5] sm:$0xff]   ;;  %v243_v2 = vld [vmem:[#allocation5 + $0x8] sm:$0xff]  }
  0x28   :  { %213 = vmatprep.subr.bf16.mxu0 %v336_v0  ;;  %229 = vmatprep.mubr.msk.bf16.mxu0 %vm337_vm0, %v336_v0  ;;  %v244_v3 = vld [vmem:[#allocation5 + $0x10] sm:$0xff]   ;;  %v245_v4 = vld [vmem:[#allocation5 + $0x18] sm:$0xff]   ;;  %v246_v5 = vld [vmem:[#allocation5 + $0x20] sm:$0xff]   ;;  %s338_s13 = smov [#allocation7]  }
  0x29   :  { %214 = vmatpush3.bf16.msra.mxu0 %v242_v1  ;;  %v247_v6 = vld [vmem:[#allocation5 + $0x28] sm:$0xff]   ;;  %v248_v7 = vld [vmem:[#allocation5 + $0x30] sm:$0xff]   ;;  %v249_v8 = vld [vmem:[#allocation5 + $0x38] sm:$0xff]   ;;  %s180_s14 = sshll.u32 %s338_s13, 4  ;;  %s181_s14 = int_to_ptr.vmem [resolvable:$true] %s180_s14 }
  0x2a   :  { %215 = vmatprep.subr.bf16.mxu0 %v336_v0  ;;  %v44_v9 = vld [vmem:[#allocation2] sm:$0xff]  ;;  %v45_v10 = vld [vmem:[#allocation2 + $0x8] sm:$0xff]  ;;  %p307_p3 = scmp.lt.s32.totalorder %s181_s14, %s181_s14 }
  0x2b   :  { %v46_v11 = vpack.c.bf16 %v45_v10, %v44_v9  ;;  %v193_v12 = vld [vmem:[%s406_s2] ss:$0 sm:$0xff]  ;;  %s302_s2 = scalar_lea.vmem %s181_s14, 256 }
  0x2c   :  { %p303_p2 = scmp.ne.s32.totalorder %s181_s14, %s302_s2  ;;  %p308_p4 = scmp.lt.s32.totalorder %s302_s2, %s302_s2 }
  0x2d   :  { %216 = vmatpush3.bf16.msra.mxu0 %v243_v2 }
  0x2e   :  { %217 = vmatprep.subr.bf16.mxu0 %v336_v0  ;;  %p309_p5 = por %p308_p4, %p307_p3 }
  0x30   :  { %p310_p6 = pnand %p309_p5, %p303_p2 }
  0x31   :  { %218 = vmatpush3.bf16.msra.mxu0 %v244_v3 }
  0x32   :  { %219 = vmatprep.subr.bf16.mxu0 %v336_v0 }
  0x35   :  { %220 = vmatpush3.bf16.msra.mxu0 %v245_v4 }
  0x36   :  { %221 = vmatprep.subr.bf16.mxu0 %v336_v0 }
  0x39   :  { %222 = vmatpush3.bf16.msra.mxu0 %v246_v5 }
  0x3a   :  { %223 = vmatprep.subr.bf16.mxu0 %v336_v0 }
  0x3d   :  { %224 = vmatpush3.bf16.msra.mxu0 %v247_v6 }
  0x3e   :  { %225 = vmatprep.subr.bf16.mxu0 %v336_v0 }
  0x41   :  { %226 = vmatpush3.bf16.msra.mxu0 %v248_v7 }
  0x42   :  { %227 = vmatprep.subr.bf16.mxu0 %v336_v0 }
  0x45   :  { %228 = vmatpush3.bf16.msra.mxu0 %v249_v8 }
  0x48   :  { %230 = vmatmul.mubr.bf16.vlgmr.msra.gmra.mrb[0].mxu0 %v46_v11 }
 0x11b   :  { %v152_v13 = vpop.f32.mrb[0].mxu0 }
 0x11c   :  { %v153_v14 = vadd.f32 %v193_v12, %v152_v13  ;;  %v231_v15 = vpop.f32.mrb[1].mxu0 }
 0x11d   :  { %v155_v16 = vpop.f32.mrb[2].mxu0 }
 0x11e   :  { %v202_v17 = vmul.f32 -1.442695, %v153_v14  ;;  %v156_v18 = vadd.f32 %v193_v12, %v155_v16  ;;  %v232_v19 = vpop.f32.mrb[3].mxu0 }
 0x120   :  { %250 = vpow2.f32 %v202_v17  ;;  %v203_v20 = vmul.f32 -1.442695, %v156_v18 }
 0x122   :  { %252 = vpow2.f32 %v203_v20 }
 0x12a   :  { %v251_v21 = vpop.eup %250 }
 0x12b   :  { %v165_v22 = vadd.f32 1.0, %v251_v21 }
 0x12c   :  { %v253_v23 = vpop.eup %252 }
 0x12d   :  { %254 = vrcp.f32 %v165_v22  ;;  %v166_v24 = vadd.f32 1.0, %v253_v23 }
 0x12f   :  { %256 = vrcp.f32 %v166_v24 }
 0x137   :  { %v255_v25 = vpop.eup %254 }
 0x138   :  { %v171_v26 = vmul.f32 %v255_v25, %v44_v9 }
 0x139   :  { %v257_v27 = vpop.eup %256 }
 0x13a   :  { %v172_v28 = vmul.f32 %v257_v27, %v45_v10  ;;  %173 = vst [vmem:[#allocation7] sm:$0xff] %v171_v26 }
 0x13c   :  { %174 = vst [vmem:[#allocation7 + $0x8] sm:$0xff] %v172_v28 }
 0x13d   :  { %313 = shalt.err (!%p310_p6)
}
 0x13e   :  { %s314_s17 = scalar_lea.hbm %s407_s3, 256 }
 0x13f   :  { %p315_p7 = scmp.ne.s32.totalorder %s407_s3, %s314_s17  ;;  %p318_p8 = scmp.lt.u32.totalorder %s314_s17, %s407_s3 }
 0x141   :  { %p320_p9 = pnand %p318_p8, %p315_p7 }
 0x143   :  { %323 = shalt.err (!%p320_p9)
}
 0x144   :  { %186 = dma.vmem_to_hbm [thread:$0]  %s181_s14, 256, %s407_s3, [#allocation4], %s331_s22, %s331_s22, %s332_s23  }
 0x145   :  { %328 = dma.done.wait [#allocation4], 256  }
 0x146   :  { %329 = vsyncadd [#allocation4], 4294967040 }
 0x147   :  { %190 = vsyncpa [#allocation3], 1 }
 0x148   :  { %191 = vsyncpa [#allocation6], 1 }
 0x149   :  { %192 = vsyncpa [#allocation4], 1 }

// kernel: tpu_custom_call.1
= control target key start
LH: loop header
LB: loop body
LE: loop exit
PB: predicated region body
PF: predicated region fallthrough
CT: control target
= control target key end

     0   :  { %8 = vsyncpa [#allocation3], 0  ;;  %s404_s0 = inlined_call_operand.hbm [shape: f32[16,128], index: 0, kind: input, shape index: {}]   ;;  %s405_s1 = inlined_call_operand.hbm [shape: bf16[128,128], index: 1, kind: input, shape index: {}]   ;;  %s406_s2 = inlined_call_operand.vmem [shape: f32[1,128], index: 2, kind: input, shape index: {}]   ;;  %s407_s3 = inlined_call_operand.hbm [shape: f32[16,128], index: 3, kind: output, shape index: {}]  }
   0x1   :  { %9 = vsyncpa [#allocation6], 0 }
   0x2   :  { %10 = vsyncpa [#allocation4], 0  ;;  %s330_s12 = smov [#allocation2]   ;;  %s258_s16 = scalar_lea.hbm %s404_s0, 256 }
   0x3   :  { %s16_s13 = sshll.u32 %s330_s12, 4  ;;  %p259_p0 = scmp.ne.s32.totalorder %s404_s0, %s258_s16  ;;  %s17_s13 = int_to_ptr.vmem [resolvable:$true] %s16_s13 }
   0x4   :  { %p262_p1 = scmp.lt.u32.totalorder %s258_s16, %s404_s0 }
   0x6   :  { %p264_p2 = pnand %p262_p1, %p259_p0 }
   0x8   :  { %267 = shalt.err (!%p264_p2)
}
   0x9   :  { %s268_s21 = scalar_lea.vmem %s17_s13, 256  ;;  %p273_p4 = scmp.lt.s32.totalorder %s17_s13, %s17_s13 }
   0xa   :  { %p269_p3 = scmp.ne.s32.totalorder %s17_s13, %s268_s21  ;;  %p274_p5 = scmp.lt.s32.totalorder %s268_s21, %s268_s21 }
   0xc   :  { %p275_p6 = por %p274_p5, %p273_p4 }
   0xe   :  { %p276_p7 = pnand %p275_p6, %p269_p3 }
  0x10   :  { %279 = shalt.err (!%p276_p7)
}
  0x11   :  { %s331_s22 = smov 128   ;;  %s332_s23 = smov 8  }
  0x12   :  { %22 = dma.hbm_to_vmem [thread:$0]  %s404_s0, 256, %s17_s13, [#allocation3], %s331_s22, %s331_s22, %s332_s23  }
  0x13   :  { %s333_s26 = smov [#allocation5]   ;;  %s280_s30 = scalar_lea.hbm %s405_s1, 1024 }
  0x14   :  { %s28_s27 = sshll.u32 %s333_s26, 4  ;;  %p281_p8 = scmp.ne.s32.totalorder %s405_s1, %s280_s30  ;;  %s29_s27 = int_to_ptr.vmem [resolvable:$true] %s28_s27 }
  0x15   :  { %p284_p9 = scmp.lt.u32.totalorder %s280_s30, %s405_s1 }
  0x17   :  { %p286_p10 = pnand %p284_p9, %p281_p8 }
  0x19   :  { %289 = shalt.err (!%p286_p10)
}
  0x1a   :  { %s290_s8 = scalar_lea.vmem %s29_s27, 1024  ;;  %p295_p12 = scmp.lt.s32.totalorder %s29_s27, %s29_s27 }
  0x1b   :  { %p291_p11 = scmp.ne.s32.totalorder %s29_s27, %s290_s8  ;;  %p296_p13 = scmp.lt.s32.totalorder %s290_s8, %s290_s8 }
  0x1d   :  { %p297_p0 = por %p296_p13, %p295_p12 }
  0x1f   :  { %p298_p1 = pnand %p297_p0, %p291_p11 }
  0x21   :  { %301 = shalt.err (!%p298_p1)
}
  0x22   :  { %s334_s0 = smov 64   ;;  %s335_s9 = smov 4  }
  0x23   :  { %34 = dma.hbm_to_vmem [thread:$0]  %s405_s1, 1024, %s29_s27, [#allocation6], %s334_s0, %s334_s0, %s335_s9  }
  0x24   :  { %324 = dma.done.wait [#allocation3], 256  }
  0x25   :  { %325 = vsyncadd [#allocation3], 4294967040 }
  0x26   :  { %326 = dma.done.wait [#allocation6], 1024  }
  0x27   :  { %327 = vsyncadd [#allocation6], 4294966272  ;;  %v336_v0 = vmov 0.0   ;;  %vm337_vm0 = vmmov 0   ;;  %v242_v1 = vld [vmem:[#allocation5] sm:$0xff]   ;;  %v243_v2 = vld [vmem:[#allocation5 + $0x8] sm:$0xff]  }
  0x28   :  { %213 = vmatprep.subr.bf16.mxu0 %v336_v0  ;;  %229 = vmatprep.mubr.msk.bf16.mxu0 %vm337_vm0, %v336_v0  ;;  %v244_v3 = vld [vmem:[#allocation5 + $0x10] sm:$0xff]   ;;  %v245_v4 = vld [vmem:[#allocation5 + $0x18] sm:$0xff]   ;;  %v246_v5 = vld [vmem:[#allocation5 + $0x20] sm:$0xff]   ;;  %s338_s13 = smov [#allocation7]  }
  0x29   :  { %214 = vmatpush3.bf16.msra.mxu0 %v242_v1  ;;  %v247_v6 = vld [vmem:[#allocation5 + $0x28] sm:$0xff]   ;;  %v248_v7 = vld [vmem:[#allocation5 + $0x30] sm:$0xff]   ;;  %v249_v8 = vld [vmem:[#allocation5 + $0x38] sm:$0xff]   ;;  %s180_s14 = sshll.u32 %s338_s13, 4  ;;  %s181_s14 = int_to_ptr.vmem [resolvable:$true] %s180_s14 }
  0x2a   :  { %215 = vmatprep.subr.bf16.mxu0 %v336_v0  ;;  %v44_v9 = vld [vmem:[#allocation2] sm:$0xff]  ;;  %v45_v10 = vld [vmem:[#allocation2 + $0x8] sm:$0xff]  ;;  %p307_p3 = scmp.lt.s32.totalorder %s181_s14, %s181_s14 }
  0x2b   :  { %v46_v11 = vpack.c.bf16 %v45_v10, %v44_v9  ;;  %v193_v12 = vld [vmem:[%s406_s2] ss:$0 sm:$0xff]  ;;  %s302_s2 = scalar_lea.vmem %s181_s14, 256 }
  0x2c   :  { %p303_p2 = scmp.ne.s32.totalorder %s181_s14, %s302_s2  ;;  %p308_p4 = scmp.lt.s32.totalorder %s302_s2, %s302_s2 }
  0x2d   :  { %216 = vmatpush3.bf16.msra.mxu0 %v243_v2 }
  0x2e   :  { %217 = vmatprep.subr.bf16.mxu0 %v336_v0  ;;  %p309_p5 = por %p308_p4, %p307_p3 }
  0x30   :  { %p310_p6 = pnand %p309_p5, %p303_p2 }
  0x31   :  { %218 = vmatpush3.bf16.msra.mxu0 %v244_v3 }
  0x32   :  { %219 = vmatprep.subr.bf16.mxu0 %v336_v0 }
  0x35   :  { %220 = vmatpush3.bf16.msra.mxu0 %v245_v4 }
  0x36   :  { %221 = vmatprep.subr.bf16.mxu0 %v336_v0 }
  0x39   :  { %222 = vmatpush3.bf16.msra.mxu0 %v246_v5 }
  0x3a   :  { %223 = vmatprep.subr.bf16.mxu0 %v336_v0 }
  0x3d   :  { %224 = vmatpush3.bf16.msra.mxu0 %v247_v6 }
  0x3e   :  { %225 = vmatprep.subr.bf16.mxu0 %v336_v0 }
  0x41   :  { %226 = vmatpush3.bf16.msra.mxu0 %v248_v7 }
  0x42   :  { %227 = vmatprep.subr.bf16.mxu0 %v336_v0 }
  0x45   :  { %228 = vmatpush3.bf16.msra.mxu0 %v249_v8 }
  0x48   :  { %230 = vmatmul.mubr.bf16.vlgmr.msra.gmra.mrb[0].mxu0 %v46_v11 }
 0x11b   :  { %v152_v13 = vpop.f32.mrb[0].mxu0 }
 0x11c   :  { %v153_v14 = vadd.f32 %v193_v12, %v152_v13  ;;  %v231_v15 = vpop.f32.mrb[1].mxu0 }
 0x11d   :  { %v155_v16 = vpop.f32.mrb[2].mxu0 }
 0x11e   :  { %v202_v17 = vmul.f32 -1.442695, %v153_v14  ;;  %v156_v18 = vadd.f32 %v193_v12, %v155_v16  ;;  %v232_v19 = vpop.f32.mrb[3].mxu0 }
 0x120   :  { %250 = vpow2.f32 %v202_v17  ;;  %v203_v20 = vmul.f32 -1.442695, %v156_v18 }
 0x122   :  { %252 = vpow2.f32 %v203_v20 }
 0x12a   :  { %v251_v21 = vpop.eup %250 }
 0x12b   :  { %v165_v22 = vadd.f32 1.0, %v251_v21 }
 0x12c   :  { %v253_v23 = vpop.eup %252 }
 0x12d   :  { %254 = vrcp.f32 %v165_v22  ;;  %v166_v24 = vadd.f32 1.0, %v253_v23 }
 0x12f   :  { %256 = vrcp.f32 %v166_v24 }
 0x137   :  { %v255_v25 = vpop.eup %254 }
 0x138   :  { %v171_v26 = vmul.f32 %v255_v25, %v44_v9 }
 0x139   :  { %v257_v27 = vpop.eup %256 }
 0x13a   :  { %v172_v28 = vmul.f32 %v257_v27, %v45_v10  ;;  %173 = vst [vmem:[#allocation7] sm:$0xff] %v171_v26 }
 0x13c   :  { %174 = vst [vmem:[#allocation7 + $0x8] sm:$0xff] %v172_v28 }
 0x13d   :  { %313 = shalt.err (!%p310_p6)
}
 0x13e   :  { %s314_s17 = scalar_lea.hbm %s407_s3, 256 }
 0x13f   :  { %p315_p7 = scmp.ne.s32.totalorder %s407_s3, %s314_s17  ;;  %p318_p8 = scmp.lt.u32.totalorder %s314_s17, %s407_s3 }
 0x141   :  { %p320_p9 = pnand %p318_p8, %p315_p7 }
 0x143   :  { %323 = shalt.err (!%p320_p9)
}
 0x144   :  { %186 = dma.vmem_to_hbm [thread:$0]  %s181_s14, 256, %s407_s3, [#allocation4], %s331_s22, %s331_s22, %s332_s23  }
 0x145   :  { %328 = dma.done.wait [#allocation4], 256  }
 0x146   :  { %329 = vsyncadd [#allocation4], 4294967040 }
 0x147   :  { %190 = vsyncpa [#allocation3], 1 }
 0x148   :  { %191 = vsyncpa [#allocation6], 1 }
 0x149   :  { %192 = vsyncpa [#allocation4], 1 }

</bundles_post_ra>
